<compile_context>
chip_gen: v6e
topology: v6e:2x2x1
jax: 0.10.0
libtpu: 0.0.40
codegen_flags: <defaults>
</compile_context>

<pallas_src>
import jax
import jax.numpy as jnp
import numpy as np
from jax.experimental import pallas as pl
from jax.experimental.pallas import tpu as pltpu

# ----------------------------- problem sizes -----------------------------
B, C, H, W = 2, 4, 16, 16       # obs: [B, C, H, W] (NCHW image -> /255 path in forward)
IN_DIM = C * H * W              # 1024
FEAT = 64                       # features_extractor output dim
SHARED = 32                     # shared_mlp output dim
K_HEADS = 3                     # number of bootstrap heads
ACT = 4                         # actions per head
OUT_PAD = 128                   # lane-dense output width (K_HEADS*ACT=12 padded to 128)
BATCH_TILE = 512                # rows per grid step when B is large
BATCH_ALIGN = 32                # uint8 sublane packing multiple


# ------------------------------- kernel ----------------------------------
def multihead_fused_kernel(
    x_ref,    # [TB, IN_DIM]      uint8 flattened obs (raw 0..255; /255 folded into w1)
    w1_ref,   # [IN_DIM, FEAT]    bf16, already scaled by 1/255
    b1_ref,   # [1, FEAT]         f32
    w2_ref,   # [FEAT, SHARED]    bf16
    b2_ref,   # [1, SHARED]       f32
    wq_ref,   # [SHARED, OUT_PAD] f32 fused dueling-head weights (cols >= K*ACT are zero)
    bq_ref,   # [1, OUT_PAD]      f32 fused dueling-head bias
    out_ref,  # [TB, OUT_PAD]     f32 lane-dense q-value slab
):
    # obs.float()/255 : cast here; the 1/255 scale lives in w1 (one-time parameter fold).
    x = x_ref[...].astype(jnp.float32)

    # features = ReLU(Linear(x))            -- bf16 MXU operands, f32 accumulate
    feat = jnp.dot(x.astype(jnp.bfloat16), w1_ref[...],
                   preferred_element_type=jnp.float32)
    feat = jnp.maximum(feat + b1_ref[...], 0.0)

    # shared = ReLU(Linear(features))
    shared = jnp.dot(feat.astype(jnp.bfloat16), w2_ref[...],
                     preferred_element_type=jnp.float32)
    shared = jnp.maximum(shared + b2_ref[...], 0.0)

    # All K dueling heads in one matmul: q_{i,j} = shared @ (wa_ij + wv_i - mean_j wa_ij) + ...
    # (combine folded into wq/bq at prep time) -> single lane-dense store.
    q = jnp.dot(shared, wq_ref[...], preferred_element_type=jnp.float32) + bq_ref[...]
    out_ref[...] = q


# ------------------------------- wrapper ----------------------------------
def multi_head_network_forward(obs, fused):
    """obs: [B, C, H, W] (uint8 preferred; any real dtype OK). Returns [B, K, ACT] f32."""
    if obs.ndim == 3:
        obs = obs[None]
    assert obs.ndim == 4, "this synthetic instantiation uses an image (NCHW) extractor"
    bn = obs.shape[0]
    x = obs.reshape(bn, -1)                        # nn.Flatten on NCHW
    assert x.shape[1] == IN_DIM

    # Pad batch to a packing-friendly multiple (covers uint8 (32,128) tiling), tile it.
    b_pad = ((bn + BATCH_ALIGN - 1) // BATCH_ALIGN) * BATCH_ALIGN
    tb = min(b_pad, BATCH_TILE)
    b_pad = ((b_pad + tb - 1) // tb) * tb
    if b_pad != bn:
        x = jnp.pad(x, ((0, b_pad - bn), (0, 0)))
    grid = (b_pad // tb,)

    out = pl.pallas_call(
        multihead_fused_kernel,
        out_shape=jax.ShapeDtypeStruct((b_pad, OUT_PAD), jnp.float32),
        grid_spec=pltpu.PrefetchScalarGridSpec(
            num_scalar_prefetch=0,
            grid=grid,
            in_specs=[
                pl.BlockSpec((tb, IN_DIM), lambda i: (i, 0)),        # x tile: streamed
                pl.BlockSpec((IN_DIM, FEAT), lambda i: (0, 0)),      # weights: VMEM-resident
                pl.BlockSpec((1, FEAT), lambda i: (0, 0)),
                pl.BlockSpec((FEAT, SHARED), lambda i: (0, 0)),
                pl.BlockSpec((1, SHARED), lambda i: (0, 0)),
                pl.BlockSpec((SHARED, OUT_PAD), lambda i: (0, 0)),
                pl.BlockSpec((1, OUT_PAD), lambda i: (0, 0)),
            ],
            out_specs=pl.BlockSpec((tb, OUT_PAD), lambda i: (i, 0)),
        ),
        compiler_params=pltpu.CompilerParams(dimension_semantics=("parallel",)),
    )(x, fused["w1"], fused["b1"], fused["w2"], fused["b2"], fused["wq"], fused["bq"])

    # lane-dense slab -> [B, K, ACT]  (free layout plumbing in the wrapper)
    return out[:bn, : K_HEADS * ACT].reshape(bn, K_HEADS, ACT)


# --------------------- one-time parameter preparation ----------------------
def prepare_fused_params(p):
    """One-time transform: fold /255 into w1, cast MXU weights to bf16, fuse dueling heads."""
    w1s = (p["w1"] * (1.0 / 255.0)).astype(jnp.bfloat16)        # /255 folded in
    w2b = p["w2"].astype(jnp.bfloat16)

    # q_{i,j} = shared @ (wa[i,:,j] + wv[i,:,0] - mean_j wa[i,:,j])
    #           + (ba[i,j] + bv[i,0] - mean_j ba[i,j])
    wq = p["wa"] + p["wv"] - p["wa"].mean(axis=2, keepdims=True)         # [K, S, A]
    bq = p["ba"] + p["bv"] - p["ba"].mean(axis=1, keepdims=True)         # [K, A]
    wq = jnp.transpose(wq, (1, 0, 2)).reshape(SHARED, K_HEADS * ACT)     # [S, K*A]
    bq = bq.reshape(1, K_HEADS * ACT)
    wq = jnp.pad(wq, ((0, 0), (0, OUT_PAD - K_HEADS * ACT)))             # lane-pad to 128
    bq = jnp.pad(bq, ((0, 0), (0, OUT_PAD - K_HEADS * ACT)))

    return {
        "w1": w1s, "b1": p["b1"].astype(jnp.float32),
        "w2": w2b, "b2": p["b2"].astype(jnp.float32),
        "wq": wq.astype(jnp.float32), "bq": bq.astype(jnp.float32),
    }


# ------------------------- deterministic params ---------------------------
def init_params(key):
    ks = jax.random.split(key, 8)

    def lin(k, fan_in, shape):
        bound = 1.0 / np.sqrt(fan_in)
        return jax.random.uniform(k, shape, jnp.float32, -bound, bound)

    return {
        "w1": lin(ks[0], IN_DIM, (IN_DIM, FEAT)),
        "b1": lin(ks[1], IN_DIM, (1, FEAT)),
        "w2": lin(ks[2], FEAT, (FEAT, SHARED)),
        "b2": lin(ks[3], FEAT, (1, SHARED)),
        "wv": lin(ks[4], SHARED, (K_HEADS, SHARED, 1)),
        "bv": lin(ks[5], SHARED, (K_HEADS, 1)),
        "wa": lin(ks[6], SHARED, (K_HEADS, SHARED, ACT)),
        "ba": lin(ks[7], SHARED, (K_HEADS, ACT)),
    }


# ------------------------ pure-JAX reference check -------------------------
def reference_forward(obs, p):
    x = obs.astype(jnp.float32).reshape(obs.shape[0], -1) / 255.0
    feat = jnp.maximum(x @ p["w1"] + p["b1"], 0.0)
    shared = jnp.maximum(feat @ p["w2"] + p["b2"], 0.0)
    qs = []
    for i in range(K_HEADS):
        v = shared @ p["wv"][i] + p["bv"][i]
        a = shared @ p["wa"][i] + p["ba"][i]
        qs.append(v + a - a.mean(axis=1, keepdims=True))
    return jnp.stack(qs, axis=1)


if __name__ == "__main__":
    key = jax.random.PRNGKey(0)
    k_obs, k_par = jax.random.split(key)
    # image-like observation, native uint8 (cast + /255 happen inside the kernel / folded weight)
    obs = jax.random.randint(k_obs, (B, C, H, W), 0, 256, dtype=jnp.int32).astype(jnp.uint8)
    params = init_params(k_par)
    fused = prepare_fused_params(params)   # one-time parameter transform

    q = multi_head_network_forward(obs, fused)
    q = jax.block_until_ready(q)

    q_ref = reference_forward(obs, params)
    assert q.shape == (B, K_HEADS, ACT) and q.dtype == jnp.float32
    # bf16 weights on the first two matmuls -> looser tolerance vs. the f32 reference
    np.testing.assert_allclose(np.asarray(q), np.asarray(q_ref), rtol=2e-2, atol=2e-2)
    print("KERNEL_OK")
</pallas_src>

<mosaic_0001>
module attributes {stable_mosaic.version = 11 : i64} {
  func.func @multihead_fused_kernel(%arg0: i32, %arg1: memref<32x1024xi8, #tpu.memory_space<vmem>>, %arg2: memref<1024x64xbf16, #tpu.memory_space<vmem>>, %arg3: memref<1x64xf32, #tpu.memory_space<vmem>>, %arg4: memref<64x32xbf16, #tpu.memory_space<vmem>>, %arg5: memref<1x32xf32, #tpu.memory_space<vmem>>, %arg6: memref<32x128xf32, #tpu.memory_space<vmem>>, %arg7: memref<1x128xf32, #tpu.memory_space<vmem>>, %arg8: memref<32x128xf32, #tpu.memory_space<vmem>>) attributes {dimension_semantics = [#tpu.dimension_semantics<parallel>], iteration_bounds = array<i64: 1>, scalar_prefetch = 0 : i64, scratch_operands = 0 : i64, tpu.core_type = #tpu.core_type<tc>, window_params = [{transform_indices = @transform_0, window_bounds = array<i64: 32, 1024>}, {pipeline_mode = #tpu.pipeline_mode<synchronous>, transform_indices = @transform_1, window_bounds = array<i64: 1024, 64>}, {pipeline_mode = #tpu.pipeline_mode<synchronous>, transform_indices = @transform_2, window_bounds = array<i64: 1, 64>}, {pipeline_mode = #tpu.pipeline_mode<synchronous>, transform_indices = @transform_3, window_bounds = array<i64: 64, 32>}, {pipeline_mode = #tpu.pipeline_mode<synchronous>, transform_indices = @transform_4, window_bounds = array<i64: 1, 32>}, {pipeline_mode = #tpu.pipeline_mode<synchronous>, transform_indices = @transform_5, window_bounds = array<i64: 32, 128>}, {pipeline_mode = #tpu.pipeline_mode<synchronous>, transform_indices = @transform_6, window_bounds = array<i64: 1, 128>}, {transform_indices = @transform_7, window_bounds = array<i64: 32, 128>}]} {
    %c0 = arith.constant 0 : index
    %c0_0 = arith.constant 0 : index
    %0 = vector.load %arg1[%c0, %c0_0] : memref<32x1024xi8, #tpu.memory_space<vmem>>, vector<32x1024xi8>
    %1 = arith.uitofp %0 : vector<32x1024xi8> to vector<32x1024xf32>
    %2 = arith.truncf %1 : vector<32x1024xf32> to vector<32x1024xbf16>
    %c0_1 = arith.constant 0 : index
    %c0_2 = arith.constant 0 : index
    %3 = vector.load %arg2[%c0_1, %c0_2] : memref<1024x64xbf16, #tpu.memory_space<vmem>>, vector<1024x64xbf16>
    %cst = arith.constant dense<0.000000e+00> : vector<32x64xf32>
    %4 = tpu.matmul %2, %3, %cst {dimension_numbers = #tpu.dot_dimension_numbers<[1], [0], [0], [1], [0, 0, 1, 1], [], []>} : vector<32x1024xbf16>, vector<1024x64xbf16>, vector<32x64xf32> -> vector<32x64xf32>
    %c0_3 = arith.constant 0 : index
    %c0_4 = arith.constant 0 : index
    %5 = vector.load %arg3[%c0_3, %c0_4] : memref<1x64xf32, #tpu.memory_space<vmem>>, vector<1x64xf32>
    %6 = vector.broadcast %5 : vector<1x64xf32> to vector<32x64xf32>
    %7 = arith.addf %4, %6 : vector<32x64xf32>
    %cst_5 = arith.constant 0.000000e+00 : f32
    %8 = vector.broadcast %cst_5 : f32 to vector<32x64xf32>
    %9 = arith.maximumf %7, %8 : vector<32x64xf32>
    %10 = arith.truncf %9 : vector<32x64xf32> to vector<32x64xbf16>
    %c0_6 = arith.constant 0 : index
    %c0_7 = arith.constant 0 : index
    %11 = vector.load %arg4[%c0_6, %c0_7] : memref<64x32xbf16, #tpu.memory_space<vmem>>, vector<64x32xbf16>
    %cst_8 = arith.constant dense<0.000000e+00> : vector<32x32xf32>
    %12 = tpu.matmul %10, %11, %cst_8 {dimension_numbers = #tpu.dot_dimension_numbers<[1], [0], [0], [1], [0, 0, 1, 1], [], []>} : vector<32x64xbf16>, vector<64x32xbf16>, vector<32x32xf32> -> vector<32x32xf32>
    %c0_9 = arith.constant 0 : index
    %c0_10 = arith.constant 0 : index
    %13 = vector.load %arg5[%c0_9, %c0_10] : memref<1x32xf32, #tpu.memory_space<vmem>>, vector<1x32xf32>
    %14 = vector.broadcast %13 : vector<1x32xf32> to vector<32x32xf32>
    %15 = arith.addf %12, %14 : vector<32x32xf32>
    %cst_11 = arith.constant 0.000000e+00 : f32
    %16 = vector.broadcast %cst_11 : f32 to vector<32x32xf32>
    %17 = arith.maximumf %15, %16 : vector<32x32xf32>
    %c0_12 = arith.constant 0 : index
    %c0_13 = arith.constant 0 : index
    %18 = vector.load %arg6[%c0_12, %c0_13] : memref<32x128xf32, #tpu.memory_space<vmem>>, vector<32x128xf32>
    %cst_14 = arith.constant dense<0.000000e+00> : vector<32x128xf32>
    %19 = tpu.matmul %17, %18, %cst_14 {dimension_numbers = #tpu.dot_dimension_numbers<[1], [0], [0], [1], [0, 0, 1, 1], [], []>} : vector<32x32xf32>, vector<32x128xf32>, vector<32x128xf32> -> vector<32x128xf32>
    %c0_15 = arith.constant 0 : index
    %c0_16 = arith.constant 0 : index
    %20 = vector.load %arg7[%c0_15, %c0_16] : memref<1x128xf32, #tpu.memory_space<vmem>>, vector<1x128xf32>
    %21 = vector.broadcast %20 : vector<1x128xf32> to vector<32x128xf32>
    %22 = arith.addf %19, %21 : vector<32x128xf32>
    %c0_17 = arith.constant 0 : index
    %c0_18 = arith.constant 0 : index
    %23 = vector.load %arg8[%c0_17, %c0_18] : memref<32x128xf32, #tpu.memory_space<vmem>>, vector<32x128xf32>
    tpu.vector_store %arg8[%c0_17, %c0_18], %22 {strides = array<i32>} : memref<32x128xf32, #tpu.memory_space<vmem>>, vector<32x128xf32>,
    return
  }
  func.func @transform_0(%arg0: i32) -> (i32, i32) {
    %c0_i32 = arith.constant 0 : i32
    %c0_i32_0 = arith.constant 0 : i32
    return %arg0, %c0_i32 : i32, i32
  }
  func.func @transform_1(%arg0: i32) -> (i32, i32) {
    %c0_i32 = arith.constant 0 : i32
    %c0_i32_0 = arith.constant 0 : i32
    %c0_i32_1 = arith.constant 0 : i32
    return %c0_i32, %c0_i32_0 : i32, i32
  }
  func.func @transform_2(%arg0: i32) -> (i32, i32) {
    %c0_i32 = arith.constant 0 : i32
    %c0_i32_0 = arith.constant 0 : i32
    %c0_i32_1 = arith.constant 0 : i32
    return %c0_i32, %c0_i32_0 : i32, i32
  }
  func.func @transform_3(%arg0: i32) -> (i32, i32) {
    %c0_i32 = arith.constant 0 : i32
    %c0_i32_0 = arith.constant 0 : i32
    %c0_i32_1 = arith.constant 0 : i32
    return %c0_i32, %c0_i32_0 : i32, i32
  }
  func.func @transform_4(%arg0: i32) -> (i32, i32) {
    %c0_i32 = arith.constant 0 : i32
    %c0_i32_0 = arith.constant 0 : i32
    %c0_i32_1 = arith.constant 0 : i32
    return %c0_i32, %c0_i32_0 : i32, i32
  }
  func.func @transform_5(%arg0: i32) -> (i32, i32) {
    %c0_i32 = arith.constant 0 : i32
    %c0_i32_0 = arith.constant 0 : i32
    %c0_i32_1 = arith.constant 0 : i32
    return %c0_i32, %c0_i32_0 : i32, i32
  }
  func.func @transform_6(%arg0: i32) -> (i32, i32) {
    %c0_i32 = arith.constant 0 : i32
    %c0_i32_0 = arith.constant 0 : i32
    %c0_i32_1 = arith.constant 0 : i32
    return %c0_i32, %c0_i32_0 : i32, i32
  }
  func.func @transform_7(%arg0: i32) -> (i32, i32) {
    %c0_i32 = arith.constant 0 : i32
    %c0_i32_0 = arith.constant 0 : i32
    return %arg0, %c0_i32 : i32, i32
  }
}

</mosaic_0001>

<bundles_post_ra>
// kernel: tpu_custom_call.1
= control target key start
LH: loop header
LB: loop body
LE: loop exit
PB: predicated region body
PF: predicated region fallthrough
CT: control target
= control target key end

     0   :  { %s1618_s0 = inlined_call_operand.vmem [shape: u8[32,1024], index: 0, kind: input, shape index: {}]   ;;  %s1619_s1 = inlined_call_operand.vmem [shape: bf16[1024,64], index: 1, kind: input, shape index: {}]   ;;  %s1620_s2 = inlined_call_operand.vmem [shape: f32[1,64], index: 2, kind: input, shape index: {}]   ;;  %s1621_s3 = inlined_call_operand.vmem [shape: bf16[64,32], index: 3, kind: input, shape index: {}]   ;;  %s1622_s4 = inlined_call_operand.vmem [shape: f32[1,32], index: 4, kind: input, shape index: {}]   ;;  %s1623_s5 = inlined_call_operand.vmem [shape: f32[32,128], index: 5, kind: input, shape index: {}]   ;;  %s1624_s6 = inlined_call_operand.vmem [shape: f32[1,128], index: 6, kind: input, shape index: {}]   ;;  %s1625_s7 = inlined_call_operand.hbm [shape: f32[32,128], index: 7, kind: output, shape index: {}]  }
   0x1   :  { %v1233_v0 = vld [vmem:[%s1619_s1 + $0x78] sm:$0xff]   ;;  %v1237_v4 = vld [vmem:[%s1619_s1 + $0x70] sm:$0xff]   ;;  %v1241_v8 = vld [vmem:[%s1619_s1 + $0x68] sm:$0xff]  }
   0x2   :  { %v1234_v1 = vld [vmem:[%s1619_s1 + $0xf8] sm:$0xff]   ;;  %1078 = vmatprep.subr.bf16.mxu0 %v1233_v0  ;;  %v1238_v5 = vld [vmem:[%s1619_s1 + $0xf0] sm:$0xff]   ;;  %v1242_v9 = vld [vmem:[%s1619_s1 + $0xe8] sm:$0xff]  }
   0x3   :  { %v1235_v2 = vld [vmem:[%s1619_s1 + $0x38] sm:$0xff]   ;;  %1106 = vmatprep.subr.bf16.mxu1 %v1234_v1  ;;  %v1239_v6 = vld [vmem:[%s1619_s1 + $0x30] sm:$0xff]   ;;  %v1243_v10 = vld [vmem:[%s1619_s1 + $0x28] sm:$0xff]  }
   0x4   :  { %v1236_v3 = vld [vmem:[%s1619_s1 + $0xb8] sm:$0xff]   ;;  %1079 = vmatpush3.bf16.msra.mxu0 %v1235_v2  ;;  %v1240_v7 = vld [vmem:[%s1619_s1 + $0xb0] sm:$0xff]   ;;  %v1244_v11 = vld [vmem:[%s1619_s1 + $0xa8] sm:$0xff]  }
   0x5   :  { %1107 = vmatpush3.bf16.msra.mxu1 %v1236_v3  ;;  %1080 = vmatprep.subr.bf16.mxu0 %v1237_v4  ;;  %v1245_v12 = vld [vmem:[%s1619_s1 + $0x60] sm:$0xff]   ;;  %v1249_v16 = vld [vmem:[%s1619_s1 + $0x58] sm:$0xff]   ;;  %v1253_v20 = vld [vmem:[%s1619_s1 + $0x50] sm:$0xff]  }
   0x6   :  { %1108 = vmatprep.subr.bf16.mxu1 %v1238_v5  ;;  %v1246_v13 = vld [vmem:[%s1619_s1 + $0xe0] sm:$0xff]   ;;  %v1250_v17 = vld [vmem:[%s1619_s1 + $0xd8] sm:$0xff]   ;;  %v1254_v21 = vld [vmem:[%s1619_s1 + $0xd0] sm:$0xff]  }
   0x7   :  { %v1247_v14 = vld [vmem:[%s1619_s1 + $0x20] sm:$0xff]   ;;  %v1251_v18 = vld [vmem:[%s1619_s1 + $0x18] sm:$0xff]   ;;  %v1255_v22 = vld [vmem:[%s1619_s1 + $0x10] sm:$0xff]  }
   0x8   :  { %1081 = vmatpush3.bf16.msra.mxu0 %v1239_v6  ;;  %v1248_v15 = vld [vmem:[%s1619_s1 + $0xa0] sm:$0xff]   ;;  %v1252_v19 = vld [vmem:[%s1619_s1 + $0x98] sm:$0xff]   ;;  %v1256_v23 = vld [vmem:[%s1619_s1 + $0x90] sm:$0xff]  }
   0x9   :  { %1109 = vmatpush3.bf16.msra.mxu1 %v1240_v7  ;;  %1082 = vmatprep.subr.bf16.mxu0 %v1241_v8  ;;  %v1257_v24 = vld [vmem:[%s1619_s1 + $0x48] sm:$0xff]   ;;  %v1261_v28 = vld [vmem:[%s1619_s1 + $0x40] sm:$0xff]   ;;  %v31_v33 = vld [vmem:[%s1618_s0 + $0x18] sm:$0xff] }
   0xa   :  { %1110 = vmatprep.subr.bf16.mxu1 %v1242_v9  ;;  %v1258_v25 = vld [vmem:[%s1619_s1 + $0xc8] sm:$0xff]   ;;  %v1262_v29 = vld [vmem:[%s1619_s1 + $0xc0] sm:$0xff]   ;;  %v39_v36 = vunpack.c.l.u8.bf16 %v31_v33  ;;  %v30_v37 = vld [vmem:[%s1618_s0 + $0x10] sm:$0xff]  ;;  %v47_v42 = vunpack.c.h.u8.bf16 %v31_v33 }
   0xb   :  { %v1259_v26 = vld [vmem:[%s1619_s1 + $0x8] sm:$0xff]   ;;  %v1263_v30 = vld [vmem:[%s1619_s1] sm:$0xff]   ;;  %v38_v40 = vunpack.c.l.u8.bf16 %v30_v37  ;;  %v1265_v41 = vld [vmem:[%s1619_s1 + $0x178] sm:$0xff]   ;;  %v46_v51 = vunpack.c.h.u8.bf16 %v30_v37 }
   0xc   :  { %1083 = vmatpush3.bf16.msra.mxu0 %v1243_v10  ;;  %v1260_v27 = vld [vmem:[%s1619_s1 + $0x88] sm:$0xff]   ;;  %v1264_v31 = vld [vmem:[%s1619_s1 + $0x80] sm:$0xff]   ;;  %652 = vmatprep.mubr.bf16.mxu1 %v39_v36  ;;  %v1266_v43 = vld [vmem:[%s1619_s1 + $0x1f8] sm:$0xff]  }
   0xd   :  { %1111 = vmatpush3.bf16.msra.mxu1 %v1244_v11  ;;  %1084 = vmatprep.subr.bf16.mxu0 %v1245_v12  ;;  %v29_v32 = vld [vmem:[%s1618_s0 + $0x8] sm:$0xff]  ;;  %v28_v34 = vld [vmem:[%s1618_s0] sm:$0xff]  ;;  %v1267_v44 = vld [vmem:[%s1619_s1 + $0x138] sm:$0xff]  }
   0xe   :  { %1112 = vmatprep.subr.bf16.mxu1 %v1246_v13  ;;  %v37_v35 = vunpack.c.l.u8.bf16 %v29_v32  ;;  %v45_v38 = vunpack.c.h.u8.bf16 %v29_v32  ;;  %v36_v39 = vunpack.c.l.u8.bf16 %v28_v34  ;;  %v1268_v45 = vld [vmem:[%s1619_s1 + $0x1b8] sm:$0xff]   ;;  %v1269_v46 = vld [vmem:[%s1619_s1 + $0x170] sm:$0xff]   ;;  %v44_v49 = vunpack.c.h.u8.bf16 %v28_v34  ;;  %v1273_v52 = vld [vmem:[%s1619_s1 + $0x168] sm:$0xff]  }
   0xf   :  { %v1270_v47 = vld [vmem:[%s1619_s1 + $0x1f0] sm:$0xff]   ;;  %v1274_v53 = vld [vmem:[%s1619_s1 + $0x1e8] sm:$0xff]   ;;  %v1277_v56 = vld [vmem:[%s1619_s1 + $0x160] sm:$0xff]  }
  0x10   :  { %1085 = vmatpush3.bf16.msra.mxu0 %v1247_v14  ;;  %603 = vmatprep.mubr.bf16.mxu0 %v37_v35  ;;  %v1271_v48 = vld [vmem:[%s1619_s1 + $0x130] sm:$0xff]   ;;  %v1275_v54 = vld [vmem:[%s1619_s1 + $0x128] sm:$0xff]   ;;  %v1278_v57 = vld [vmem:[%s1619_s1 + $0x1e0] sm:$0xff]  }
  0x11   :  { %1113 = vmatpush3.bf16.msra.mxu1 %v1248_v15  ;;  %1086 = vmatprep.subr.bf16.mxu0 %v1249_v16  ;;  %v1272_v50 = vld [vmem:[%s1619_s1 + $0x1b0] sm:$0xff]   ;;  %v1276_v55 = vld [vmem:[%s1619_s1 + $0x1a8] sm:$0xff]   ;;  %v1279_v58 = vld [vmem:[%s1619_s1 + $0x120] sm:$0xff]  }
  0x12   :  { %1114 = vmatprep.subr.bf16.mxu1 %v1250_v17  ;;  %v1280_v59 = vld [vmem:[%s1619_s1 + $0x1a0] sm:$0xff]   ;;  %v1281_v60 = vld [vmem:[%s1619_s1 + $0x158] sm:$0xff]   ;;  %v1285_v0 = vld [vmem:[%s1619_s1 + $0x150] sm:$0xff]  }
  0x13   :  { %v1282_v61 = vld [vmem:[%s1619_s1 + $0x1d8] sm:$0xff]   ;;  %v1286_v1 = vld [vmem:[%s1619_s1 + $0x1d0] sm:$0xff]   ;;  %v1289_v4 = vld [vmem:[%s1619_s1 + $0x148] sm:$0xff]  }
  0x14   :  { %1087 = vmatpush3.bf16.msra.mxu0 %v1251_v18  ;;  %v1283_v62 = vld [vmem:[%s1619_s1 + $0x118] sm:$0xff]   ;;  %v1287_v2 = vld [vmem:[%s1619_s1 + $0x110] sm:$0xff]   ;;  %v1290_v5 = vld [vmem:[%s1619_s1 + $0x1c8] sm:$0xff]  }
  0x15   :  { %1115 = vmatpush3.bf16.msra.mxu1 %v1252_v19  ;;  %1088 = vmatprep.subr.bf16.mxu0 %v1253_v20  ;;  %v1284_v63 = vld [vmem:[%s1619_s1 + $0x198] sm:$0xff]   ;;  %v1288_v3 = vld [vmem:[%s1619_s1 + $0x190] sm:$0xff]   ;;  %v1291_v6 = vld [vmem:[%s1619_s1 + $0x108] sm:$0xff]  }
  0x16   :  { %1116 = vmatprep.subr.bf16.mxu1 %v1254_v21  ;;  %v1292_v7 = vld [vmem:[%s1619_s1 + $0x188] sm:$0xff]   ;;  %v1293_v8 = vld [vmem:[%s1619_s1 + $0x140] sm:$0xff]   ;;  %v35_v13 = vld [vmem:[%s1618_s0 + $0x38] sm:$0xff] }
  0x17   :  { %v1294_v9 = vld [vmem:[%s1619_s1 + $0x1c0] sm:$0xff]   ;;  %v33_v12 = vld [vmem:[%s1618_s0 + $0x28] sm:$0xff]  ;;  %v43_v15 = vunpack.c.l.u8.bf16 %v35_v13  ;;  %v34_v17 = vld [vmem:[%s1618_s0 + $0x30] sm:$0xff]  ;;  %v51_v21 = vunpack.c.h.u8.bf16 %v35_v13 }
  0x18   :  { %1089 = vmatpush3.bf16.msra.mxu0 %v1255_v22  ;;  %v1295_v10 = vld [vmem:[%s1619_s1 + $0x100] sm:$0xff]   ;;  %v41_v14 = vunpack.c.l.u8.bf16 %v33_v12  ;;  %v49_v18 = vunpack.c.h.u8.bf16 %v33_v12  ;;  %v42_v20 = vunpack.c.l.u8.bf16 %v34_v17 }
  0x19   :  { %1117 = vmatpush3.bf16.msra.mxu1 %v1256_v23  ;;  %1090 = vmatprep.subr.bf16.mxu0 %v1257_v24  ;;  %v1296_v11 = vld [vmem:[%s1619_s1 + $0x180] sm:$0xff]  }
  0x1a   :  { %1118 = vmatprep.subr.bf16.mxu1 %v1258_v25  ;;  %v32_v16 = vld [vmem:[%s1618_s0 + $0x20] sm:$0xff] }
  0x1b   :  { %v40_v19 = vunpack.c.l.u8.bf16 %v32_v16 }
  0x1c   :  { %1091 = vmatpush3.bf16.msra.mxu0 %v1259_v26 }
  0x1d   :  { %1119 = vmatpush3.bf16.msra.mxu1 %v1260_v27  ;;  %1092 = vmatprep.subr.bf16.mxu0 %v1261_v28 }
  0x1e   :  { %1120 = vmatprep.subr.bf16.mxu1 %v1262_v29 }
  0x20   :  { %1093 = vmatpush3.bf16.msra.mxu0 %v1263_v30 }
  0x21   :  { %1121 = vmatpush3.bf16.msra.mxu1 %v1264_v31  ;;  %1134 = vmatprep.subr.bf16.mxu0 %v1265_v41 }
  0x22   :  { %1162 = vmatprep.subr.bf16.mxu1 %v1266_v43 }
  0x23   :  { %604 = vmatmul.mubr.bf16.vlgmr.msra.gmra.mxu0 %v36_v39 }
  0x24   :  { %653 = vmatmul.mubr.bf16.vlgmr.msra.gmra.mxu1 %v38_v40  ;;  %1135 = vmatpush3.bf16.msra.mxu0 %v1267_v44 }
  0x25   :  { %611 = vmatprep.mubr.bf16.mxu0 %v45_v38  ;;  %1163 = vmatpush3.bf16.msra.mxu1 %v1268_v45 }
  0x26   :  { %660 = vmatprep.mubr.bf16.mxu1 %v47_v42  ;;  %1136 = vmatprep.subr.bf16.mxu0 %v1269_v46 }
  0x27   :  { %1164 = vmatprep.subr.bf16.mxu1 %v1270_v47 }
  0x28   :  { %1137 = vmatpush3.bf16.msra.mxu0 %v1271_v48 }
  0x29   :  { %1165 = vmatpush3.bf16.msra.mxu1 %v1272_v50  ;;  %1138 = vmatprep.subr.bf16.mxu0 %v1273_v52 }
  0x2a   :  { %1166 = vmatprep.subr.bf16.mxu1 %v1274_v53 }
  0x2b   :  { %612 = vmatmul.mubr.bf16.gmra.mxu0 %v44_v49 }
  0x2c   :  { %661 = vmatmul.mubr.bf16.gmra.mxu1 %v46_v51  ;;  %1139 = vmatpush3.bf16.msra.mxu0 %v1275_v54 }
  0x2d   :  { %1167 = vmatpush3.bf16.msra.mxu1 %v1276_v55  ;;  %1140 = vmatprep.subr.bf16.mxu0 %v1277_v56 }
  0x2e   :  { %1168 = vmatprep.subr.bf16.mxu1 %v1278_v57  ;;  %701 = vmatprep.mubr.bf16.mxu0 %v41_v14 }
  0x2f   :  { %750 = vmatprep.mubr.bf16.mxu1 %v43_v15 }
  0x30   :  { %1141 = vmatpush3.bf16.msra.mxu0 %v1279_v58 }
  0x31   :  { %1169 = vmatpush3.bf16.msra.mxu1 %v1280_v59  ;;  %1142 = vmatprep.subr.bf16.mxu0 %v1281_v60 }
  0x32   :  { %1170 = vmatprep.subr.bf16.mxu1 %v1282_v61 }
  0x34   :  { %1143 = vmatpush3.bf16.msra.mxu0 %v1283_v62 }
  0x35   :  { %1171 = vmatpush3.bf16.msra.mxu1 %v1284_v63  ;;  %1144 = vmatprep.subr.bf16.mxu0 %v1285_v0 }
  0x36   :  { %1172 = vmatprep.subr.bf16.mxu1 %v1286_v1 }
  0x38   :  { %1145 = vmatpush3.bf16.msra.mxu0 %v1287_v2 }
  0x39   :  { %1173 = vmatpush3.bf16.msra.mxu1 %v1288_v3  ;;  %1146 = vmatprep.subr.bf16.mxu0 %v1289_v4 }
  0x3a   :  { %1174 = vmatprep.subr.bf16.mxu1 %v1290_v5 }
  0x3c   :  { %1147 = vmatpush3.bf16.msra.mxu0 %v1291_v6 }
  0x3d   :  { %1175 = vmatpush3.bf16.msra.mxu1 %v1292_v7  ;;  %1148 = vmatprep.subr.bf16.mxu0 %v1293_v8 }
  0x3e   :  { %1176 = vmatprep.subr.bf16.mxu1 %v1294_v9 }
  0x40   :  { %1149 = vmatpush3.bf16.msra.mxu0 %v1295_v10 }
  0x41   :  { %1177 = vmatpush3.bf16.msra.mxu1 %v1296_v11 }
  0x43   :  { %702 = vmatmul.mubr.bf16.vlgmr.msra.gmra.mxu0 %v40_v19 }
  0x44   :  { %12 = vsyncpa [#allocation3], 0  ;;  %751 = vmatmul.mubr.bf16.vlgmr.msra.gmra.mxu1 %v42_v20  ;;  %709 = vmatprep.mubr.bf16.mxu0 %v49_v18  ;;  %v48_v22 = vunpack.c.h.u8.bf16 %v32_v16  ;;  %v50_v23 = vunpack.c.h.u8.bf16 %v34_v17  ;;  %v1297_v24 = vld [vmem:[%s1621_s3 + $0x18] sm:$0xff]   ;;  %v1298_v25 = vld [vmem:[%s1621_s3 + $0x10] sm:$0xff]   ;;  %vm812_vm0 = vcmask 523264   ;;  %vm883_vm1 = vcmask 261120  }
  0x45   :  { %758 = vmatprep.mubr.bf16.mxu1 %v51_v21  ;;  %1204 = vmatprep.subr.bf16.mxu0 %v1297_v24  ;;  %v1299_v26 = vld [vmem:[%s1621_s3 + $0x8] sm:$0xff]   ;;  %v1300_v27 = vld [vmem:[%s1621_s3] sm:$0xff]   ;;  %v875_v28 = vld [vmem:[%s1623_s5 + $0x18] sm:$0xff] }
  0x46   :  { %1205 = vmatpush3.bf16.msra.mxu0 %v1297_v24  ;;  %v874_v29 = vld [vmem:[%s1623_s5 + $0x10] sm:$0xff]  ;;  %1216 = vmatprep.subr.mxu1 %v875_v28  ;;  %v1001_v45 = vld [vmem:[%s1620_s2] ss:$0 sm:$0xff] }
  0x47   :  { %1206 = vmatprep.subr.bf16.mxu0 %v1298_v25  ;;  %1217 = vmatpush3.msra.mxu1 %v875_v28 }
  0x48   :  { %1218 = vmatprep.subr.mxu1 %v874_v29 }
  0x49   :  { %1219 = vmatpush3.msra.mxu1 %v874_v29 }
  0x4a   :  { %1207 = vmatpush3.bf16.msra.mxu0 %v1298_v25 }
  0x4b   :  { %710 = vmatmul.mubr.bf16.gmra.mxu0 %v48_v22  ;;  %1208 = vmatprep.subr.bf16.mxu0 %v1299_v26 }
  0x4c   :  { %759 = vmatmul.mubr.bf16.gmra.mxu1 %v50_v23 }
  0x4e   :  { %1209 = vmatpush3.bf16.msra.mxu0 %v1299_v26 }
  0x4f   :  { %1210 = vmatprep.subr.bf16.mxu0 %v1300_v27 }
  0x52   :  { %1211 = vmatpush3.bf16.msra.mxu0 %v1300_v27 }
  0xe3   :  { %v1094_v30 = vpop.f32.mrf.mxu0 }
  0xe4   :  { %v1122_v31 = vpop.f32.mrf.mxu1 }
  0xe5   :  { %v1095_v32 = vpop.f32.mrf.mxu0 }
  0xe6   :  { %v1123_v33 = vpop.f32.mrf.mxu1  ;;  %v1096_v43 = vadd.f32 %v1095_v32, %v1094_v30 }
  0xe7   :  { %v1097_v34 = vpop.f32.mrf.mxu0  ;;  %v1124_v48 = vadd.f32 %v1123_v33, %v1122_v31 }
  0xe8   :  { %v1125_v35 = vpop.f32.mrf.mxu1  ;;  %v606_v47 = vadd.f32 %v1096_v43, %v1001_v45 }
  0xe9   :  { %v1098_v36 = vpop.f32.mrf.mxu0 }
  0xea   :  { %v1126_v37 = vpop.f32.mrf.mxu1  ;;  %v1099_v49 = vadd.f32 %v1098_v36, %v1097_v34  ;;  %v655_v55 = vadd.f32 %v1124_v48, %v606_v47 }
  0xeb   :  { %v1100_v38 = vpop.f32.mrf.mxu0  ;;  %v1127_v60 = vadd.f32 %v1126_v37, %v1125_v35  ;;  %v873_v37 = vld [vmem:[%s1623_s5 + $0x8] sm:$0xff] }
  0xec   :  { %v1128_v39 = vpop.f32.mrf.mxu1  ;;  %v609_v56 = vadd.f32 %v1099_v49, %v1001_v45  ;;  %1220 = vmatprep.subr.mxu1 %v873_v37 }
  0xed   :  { %v1101_v40 = vpop.f32.mrf.mxu0  ;;  %1221 = vmatpush3.msra.mxu1 %v873_v37 }
  0xee   :  { %v1129_v41 = vpop.f32.mrf.mxu1  ;;  %v1102_v53 = vadd.f32 %v1101_v40, %v1100_v38  ;;  %v658_v2 = vadd.f32 %v1127_v60, %v609_v56  ;;  %v872_v38 = vld [vmem:[%s1623_s5] sm:$0xff] }
  0xef   :  { %v1103_v42 = vpop.f32.mrf.mxu0  ;;  %v1130_v0 = vadd.f32 %v1129_v41, %v1128_v39  ;;  %1222 = vmatprep.subr.mxu1 %v872_v38  ;;  %v1066_v40 = vld [vmem:[%s1622_s4] ss:$0 sm:$0xff]  ;;  %s1323_s4 = smov [#allocation2]  }
  0xf0   :  { %v1131_v44 = vpop.f32.mrf.mxu1  ;;  %v614_v63 = vadd.f32 %v1102_v53, %v1001_v45  ;;  %1223 = vmatpush3.msra.mxu1 %v872_v38  ;;  %s990_s24 = sshll.u32 %s1323_s4, 4  ;;  %s991_s24 = int_to_ptr.vmem [resolvable:$true] %s990_s24 }
  0xf1   :  { %v1104_v46 = vpop.f32.mrf.mxu0  ;;  %s1301_s25 = scalar_lea.vmem %s991_s24, 512  ;;  %p1306_p1 = scmp.lt.s32.totalorder %s991_s24, %s991_s24 }
  0xf2   :  { %v1132_v50 = vpop.f32.mrf.mxu1  ;;  %v1105_v3 = vadd.f32 %v1104_v46, %v1103_v42  ;;  %v663_v12 = vadd.f32 %v1130_v0, %v614_v63  ;;  %p1302_p0 = scmp.ne.s32.totalorder %s991_s24, %s1301_s25  ;;  %p1307_p2 = scmp.lt.s32.totalorder %s1301_s25, %s1301_s25 }
  0xf3   :  { %v1133_v15 = vadd.f32 %v1132_v50, %v1131_v44 }
  0xf4   :  { %v617_v14 = vadd.f32 %v1105_v3, %v1001_v45  ;;  %p1308_p3 = por %p1307_p2, %p1306_p1 }
  0xf6   :  { %v666_v25 = vadd.f32 %v1133_v15, %v617_v14  ;;  %p1309_p4 = pnand %p1308_p3, %p1302_p0 }
 0x103   :  { %v1150_v51 = vpop.f32.mrf.mxu0 }
 0x104   :  { %v1178_v52 = vpop.f32.mrf.mxu1 }
 0x105   :  { %v1151_v54 = vpop.f32.mrf.mxu0 }
 0x106   :  { %v1152_v57 = vadd.f32 %v1151_v54, %v1150_v51  ;;  %v1179_v58 = vpop.f32.mrf.mxu1 }
 0x107   :  { %v1153_v59 = vpop.f32.mrf.mxu0  ;;  %v1180_v4 = vadd.f32 %v1179_v58, %v1178_v52  ;;  %v1073_v52 = vld [vmem:[%s1624_s6] ss:$0 sm:$0xff] }
 0x108   :  { %v704_v61 = vadd.f32 %v1152_v57, %v655_v55  ;;  %v1181_v62 = vpop.f32.mrf.mxu1 }
 0x109   :  { %v1154_v1 = vpop.f32.mrf.mxu0 }
 0x10a   :  { %v1155_v5 = vadd.f32 %v1154_v1, %v1153_v59  ;;  %v1182_v6 = vpop.f32.mrf.mxu1  ;;  %v753_v8 = vadd.f32 %v1180_v4, %v704_v61 }
 0x10b   :  { %v1156_v7 = vpop.f32.mrf.mxu0  ;;  %v1183_v10 = vadd.f32 %v1182_v6, %v1181_v62 }
 0x10c   :  { %v707_v9 = vadd.f32 %v1155_v5, %v658_v2  ;;  %v1184_v11 = vpop.f32.mrf.mxu1  ;;  %v767_v20 = vmax.f32 %v753_v8, 0.0 }
 0x10d   :  { %v1157_v13 = vpop.f32.mrf.mxu0 }
 0x10e   :  { %v756_v16 = vadd.f32 %v1183_v10, %v707_v9  ;;  %v1158_v17 = vadd.f32 %v1157_v13, %v1156_v7  ;;  %v1185_v18 = vpop.f32.mrf.mxu1 }
 0x10f   :  { %v1159_v19 = vpop.f32.mrf.mxu0  ;;  %v1186_v27 = vadd.f32 %v1185_v18, %v1184_v11 }
 0x110   :  { %v768_v21 = vmax.f32 %v756_v16, 0.0  ;;  %v712_v22 = vadd.f32 %v1158_v17, %v663_v12  ;;  %v1187_v23 = vpop.f32.mrf.mxu1 }
 0x111   :  { %v1160_v24 = vpop.f32.mrf.mxu0 }
 0x112   :  { %v771_v26 = vpack.c.bf16 %v768_v21, %v767_v20  ;;  %v1161_v28 = vadd.f32 %v1160_v24, %v1159_v19  ;;  %v1188_v29 = vpop.f32.mrf.mxu1  ;;  %v761_v30 = vadd.f32 %v1186_v27, %v712_v22 }
 0x113   :  { %v1189_v32 = vadd.f32 %v1188_v29, %v1187_v23 }
 0x114   :  { %v715_v31 = vadd.f32 %v1161_v28, %v666_v25  ;;  %1212 = vmatprep.mubr.msk.bf16.mxu0 %vm812_vm0, %v771_v26  ;;  %v769_v34 = vmax.f32 %v761_v30, 0.0 }
 0x116   :  { %v764_v33 = vadd.f32 %v1189_v32, %v715_v31 }
 0x118   :  { %v770_v35 = vmax.f32 %v764_v33, 0.0 }
 0x11a   :  { %v772_v36 = vpack.c.bf16 %v770_v35, %v769_v34 }
 0x11c   :  { %1213 = vmatmul.mubr.msk.bf16.vlgmr.msra.gmra.mxu0 %vm812_vm0, %v772_v36 }
 0x1dc   :  { %v1214_v39 = vpop.f32.mrf.mxu0 }
 0x1dd   :  { %v862_v45 = vadd.f32 %v1214_v39, %v1066_v40 }
 0x1de   :  { %v853_v41 = vpop.f32.mrf.mxu0 }
 0x1df   :  { %v854_v42 = vadd.f32 %v1066_v40, %v853_v41  ;;  %v870_v50 = vmax.f32 %v862_v45, 0.0 }
 0x1e0   :  { %v1215_v43 = vpop.f32.mrf.mxu0 }
 0x1e1   :  { %v868_v44 = vmax.f32 %v854_v42, 0.0  ;;  %v865_v48 = vadd.f32 %v1215_v43, %v1066_v40 }
 0x1e2   :  { %v856_v46 = vpop.f32.mrf.mxu0 }
 0x1e3   :  { %v857_v47 = vadd.f32 %v1066_v40, %v856_v46  ;;  %1224 = vmatprep.mubr.msk.f32.mxu1 %vm883_vm1, %v868_v44  ;;  %v871_v51 = vmax.f32 %v865_v48, 0.0 }
 0x1e5   :  { %v869_v49 = vmax.f32 %v857_v47, 0.0 }
 0x1e7   :  { %1225 = vmatmul.mubr.msk.f32.vlgmr.msra.gmra.mxu1 %vm883_vm1, %v869_v49 }
 0x1e8   :  { %1227 = vmatprep.mubr.msk.f32.mxu1 %vm883_vm1, %v870_v50 }
 0x1eb   :  { %1228 = vmatmul.mubr.msk.f32.gmra.mxu1 %vm883_vm1, %v871_v51 }
 0x2a7   :  { %v1226_v53 = vpop.f32.mrf.mxu1 }
 0x2a8   :  { %v968_v54 = vadd.f32 %v1226_v53, %v1073_v52 }
 0x2a9   :  { %v962_v55 = vpop.f32.mrf.mxu1 }
 0x2aa   :  { %982 = vst [vmem:[#allocation2 + $0x8] sm:$0xff] %v968_v54  ;;  %v963_v56 = vadd.f32 %v1073_v52, %v962_v55 }
 0x2ab   :  { %v1229_v57 = vpop.f32.mrf.mxu1 }
 0x2ac   :  { %981 = vst [vmem:[#allocation2] sm:$0xff] %v963_v56  ;;  %v978_v58 = vadd.f32 %v1229_v57, %v1073_v52 }
 0x2ad   :  { %v972_v59 = vpop.f32.mrf.mxu1 }
 0x2ae   :  { %984 = vst [vmem:[#allocation2 + $0x18] sm:$0xff] %v978_v58  ;;  %v973_v60 = vadd.f32 %v1073_v52, %v972_v59 }
 0x2b0   :  { %983 = vst [vmem:[#allocation2 + $0x10] sm:$0xff] %v973_v60 }
 0x2b1   :  { %1312 = shalt.err (!%p1309_p4)
}
 0x2b2   :  { %s1324_s6 = smov 128   ;;  %s1325_s26 = smov 8  }
 0x2b3   :  { %996 = dma.vmem_to_hbm [thread:$0]  %s991_s24, 512, %s1625_s7, [#allocation3], %s1324_s6, %s1324_s6, %s1325_s26  }
 0x2b4   :  { %1321 = dma.done.wait [#allocation3], 512  }
 0x2b5   :  { %1322 = vsyncadd [#allocation3], 4294966784 }
 0x2b6   :  { %1000 = vsyncpa [#allocation3], 1 }

</bundles_post_ra>
